<compile_context>
chip_gen: v5e
topology: v5e:2x2
jax: 0.10.0
libtpu: 0.0.40
codegen_flags: <defaults>
</compile_context>

<pallas_src>
import jax
import jax.numpy as jnp
from jax.experimental import pallas as pl
from jax.experimental.pallas import tpu as pltpu


def _round_up(x: int, m: int) -> int:
    return ((x + m - 1) // m) * m


def _vmem_ceiling_bytes() -> int:
    """Per-core VMEM capacity with ~12.5% headroom for compiler internal scratch."""
    cap = None
    try:
        cap = getattr(pltpu.get_tpu_info(), "vmem_capacity_bytes", None)
    except Exception:
        cap = None
    if not cap:
        cap = 64 * 1024 * 1024          # conservative fallback (v7x per-TC VMEM)
    return int(cap) * 7 // 8            # ~56 MiB on v7x, ~112 MiB on v5e/v6e


def _gather_norm_kernel(ids_ref, hi_ref, mid_ref, lo_ref, out_ref):
    """One grid step: gather counts rows for one token chunk from one V-slice of
    the bf16-split counts table via a one-hot MXU matmul, accumulate into the
    resident output block, and normalize rows on the last V-slice."""
    v = pl.program_id(1)
    nv = pl.num_programs(1)

    @pl.when(v == 0)
    def _init():
        out_ref[...] = jnp.zeros_like(out_ref)

    tn = out_ref.shape[0]
    tv = hi_ref.shape[0]
    ids = ids_ref[...]                                            # (TN, 1) int32
    col = jax.lax.broadcasted_iota(jnp.int32, (tn, tv), 1) + v * tv
    onehot = (ids == col).astype(jnp.bfloat16)                    # (TN, TV) bf16

    # Exact row selection: counts == hi + mid + lo (3-term bf16 split, <=1 ulp)
    # and a 0/1 one-hot is exactly representable in bf16, so three plain bf16
    # MXU passes reproduce the f32 rows (no Precision.HIGHEST needed).
    acc = jnp.dot(onehot, hi_ref[...], preferred_element_type=jnp.float32)
    acc = acc + jnp.dot(onehot, mid_ref[...], preferred_element_type=jnp.float32)
    acc = acc + jnp.dot(onehot, lo_ref[...], preferred_element_type=jnp.float32)
    out_ref[...] += acc

    @pl.when(v == nv - 1)
    def _finalize():
        rows = out_ref[...]                                       # gathered raw counts
        s = jnp.sum(rows, axis=-1, keepdims=True)                 # XLU lane reduce
        norm = jnp.where(s > 0, s, jnp.float32(1.0))
        out_ref[...] = rows / norm                                # fused normalization


def hmm_pronunciator_forward(x, pron_counts, ignore_index=-100,
                             max_onehot_vocab=2048,
                             tn_override=None, tv_override=None):
    """Pallas implementation of HMMPronunciator.forward.

    x:            int array, any shape (token ids; `ignore_index` remapped to 0)
    pron_counts:  [V, P] float32 pronunciation counts
    returns       pronounce_prob()[ids] with shape [*x.shape, P] (float32)
    """
    V, P = pron_counts.shape
    x_shape = x.shape

    # Glue (plain XLA): ignore_index remap; clip guards the gather against
    # out-of-range ids (PyTorch would raise on invalid ids; documented divergence).
    ids = jnp.where(x != ignore_index, x, 0).astype(jnp.int32)
    ids = jnp.clip(ids, 0, V - 1).reshape(-1)
    N = int(ids.shape[0])

    Pp = _round_up(P, 128)              # lane axis multiple of 128
    V_ALIGN = 16                        # bf16 sublane packing for the split tables

    # ---- V-axis slicing: resident table for small vocab, streamed slices else ----
    if tv_override is not None:
        TVtab = _round_up(max(V_ALIGN, min(tv_override, _round_up(V, V_ALIGN))), V_ALIGN)
    elif V <= max_onehot_vocab:
        TVtab = _round_up(V, V_ALIGN)   # whole table resident (single V slice)
    else:
        # TODO(synk): beyond a few thousand rows the one-hot gather is O(N*V*P)
        # compute; a DMA true-gather (scalar-prefetched ids + pl.Element row
        # index_map) would keep it memory-bound.  The V-sliced accumulate below
        # at least keeps VMEM bounded for any vocabulary size.
        TVtab = min(512, _round_up(V, V_ALIGN))
    Vp = _round_up(V, TVtab)
    resident = (TVtab == Vp)

    # ---- token chunking: ~1-2 MiB f32 output tiles, one-hot temp budgeted ----
    ONEHOT_BUDGET_ELEMS = 2 << 20       # cap on the (TN, TVtab) one-hot/iota temporaries
    tn_cap = max(8, (ONEHOT_BUDGET_ELEMS // TVtab) // 8 * 8)
    if tn_override is not None:
        TN = _round_up(max(8, tn_override), 8)
    else:
        TN = max(8, min(2048, _round_up(N, 8), tn_cap))

    # ---- explicit VMEM accounting vs the per-core capacity ----
    table_bufs = 1 if resident else 2   # resident invariant table is single-buffered

    def vmem_needed(tn):
        return (3 * TVtab * Pp * 2 * table_bufs   # hi/mid/lo bf16 table blocks
                + 2 * tn * Pp * 4                 # f32 out tile, double-buffered
                + 2 * tn * 128 * 4                # ids tile (i32, lane-padded)
                + tn * TVtab * 8                  # one-hot + iota/compare temporaries
                + (4 << 20))                      # Mosaic internal-scratch headroom

    ceiling = _vmem_ceiling_bytes()
    while TN > 8 and vmem_needed(TN) > ceiling:
        TN = max(8, (TN // 2) // 8 * 8)
    vmem_limit = int(min(max(vmem_needed(TN), 16 << 20), ceiling))

    Np = _round_up(N, TN)
    ids2 = jnp.pad(ids, (0, Np - N)).reshape(Np, 1)   # pad rows gather row 0; sliced off

    # ---- 3-term bf16 split of the raw counts (once, fused XLA elementwise) ----
    counts = pron_counts.astype(jnp.float32)
    if (Vp, Pp) != (V, P):
        counts = jnp.pad(counts, ((0, Vp - V), (0, Pp - P)))      # zero rows stay zero
    hi = counts.astype(jnp.bfloat16)
    r1 = counts - hi.astype(jnp.float32)
    mid = r1.astype(jnp.bfloat16)
    lo = (r1 - mid.astype(jnp.float32)).astype(jnp.bfloat16)

    def table_spec():
        if resident:  # invariant block: keep a single VMEM copy for the whole grid
            return pl.BlockSpec((TVtab, Pp), lambda n, v: (v, 0),
                                pipeline_mode=pl.Buffered(1))
        return pl.BlockSpec((TVtab, Pp), lambda n, v: (v, 0))

    out = pl.pallas_call(
        _gather_norm_kernel,
        out_shape=jax.ShapeDtypeStruct((Np, Pp), jnp.float32),
        grid_spec=pl.GridSpec(
            grid=(Np // TN, Vp // TVtab),                 # (token chunks, V slices)
            in_specs=[
                pl.BlockSpec((TN, 1), lambda n, v: (n, 0)),   # token-id chunk
                table_spec(), table_spec(), table_spec(),     # hi / mid / lo tables
            ],
            out_specs=pl.BlockSpec((TN, Pp), lambda n, v: (n, 0)),  # resident across v
        ),
        compiler_params=pltpu.CompilerParams(
            dimension_semantics=("parallel", "arbitrary"),
            vmem_limit_bytes=vmem_limit),
    )(ids2, hi, mid, lo)

    # TODO(synk): optional bfloat16 output (halves the HBM writeback, ~2x on the
    # memory-bound path) is a semantics change vs the f32 reference; add behind a
    # flag (with an f32 scratch accumulator) if downstream tolerates it.
    out = out[:N, :P]
    return out.reshape(*x_shape, P)


def _reference_forward(x, pron_counts, ignore_index=-100):
    ids = jnp.where(x != ignore_index, x, 0)
    norm = pron_counts.sum(axis=1, keepdims=True)
    norm = jnp.where(norm > 0, norm, 1.0)
    prob = pron_counts / norm
    return prob[ids]


if __name__ == "__main__":
    key = jax.random.PRNGKey(0)
    k_counts, k_idx, k_counts2, k_idx2 = jax.random.split(key, 4)

    # --- test 1: small vocab -> resident, single-buffered table path ---
    V, P = 16, 128        # len(vocab), len(phone_set)
    B, T = 2, 8           # token-index batch / sequence
    pron_counts = jax.random.uniform(k_counts, (V, P), dtype=jnp.float32) * 5.0
    pron_counts = pron_counts.at[3].set(0.0)          # exercise the norm > 0 branch
    x = jax.random.randint(k_idx, (B, T), 0, V, dtype=jnp.int32)
    x = x.at[0, 0].set(-100)                          # ignore_index entries
    x = x.at[1, 5].set(-100)

    out = jax.block_until_ready(hmm_pronunciator_forward(x, pron_counts))
    ref = _reference_forward(x, pron_counts)
    assert out.shape == (B, T, P), out.shape
    assert jnp.allclose(out, ref, atol=1e-6, rtol=1e-6), "mismatch (resident path)"

    # --- test 2: force the streamed V-sliced accumulate path (multi chunk/slice) ---
    V2 = 48
    pron_counts2 = jax.random.uniform(k_counts2, (V2, P), dtype=jnp.float32) * 5.0
    pron_counts2 = pron_counts2.at[7].set(0.0)
    x2 = jax.random.randint(k_idx2, (B, T), 0, V2, dtype=jnp.int32)
    x2 = x2.at[1, 2].set(-100)

    out2 = jax.block_until_ready(
        hmm_pronunciator_forward(x2, pron_counts2, tn_override=8, tv_override=16))
    ref2 = _reference_forward(x2, pron_counts2)
    assert out2.shape == (B, T, P), out2.shape
    assert jnp.allclose(out2, ref2, atol=1e-6, rtol=1e-6), "mismatch (streamed path)"

    print("KERNEL_OK")
</pallas_src>

<mosaic_0001>
module attributes {stable_mosaic.version = 11 : i64} {
  func.func @_gather_norm_kernel(%arg0: i32, %arg1: i32, %arg2: memref<16x1xi32, #tpu.memory_space<vmem>>, %arg3: memref<16x128xbf16, #tpu.memory_space<vmem>>, %arg4: memref<16x128xbf16, #tpu.memory_space<vmem>>, %arg5: memref<16x128xbf16, #tpu.memory_space<vmem>>, %arg6: memref<16x128xf32, #tpu.memory_space<vmem>>) attributes {dimension_semantics = [#tpu.dimension_semantics<parallel>, #tpu.dimension_semantics<arbitrary>], iteration_bounds = array<i64: 1, 1>, scalar_prefetch = 0 : i64, scratch_operands = 0 : i64, tpu.core_type = #tpu.core_type<tc>, window_params = [{transform_indices = @transform_0, window_bounds = array<i64: 16, 1>}, {pipeline_mode = #tpu.pipeline_mode<synchronous>, transform_indices = @transform_1, window_bounds = array<i64: 16, 128>}, {pipeline_mode = #tpu.pipeline_mode<synchronous>, transform_indices = @transform_2, window_bounds = array<i64: 16, 128>}, {pipeline_mode = #tpu.pipeline_mode<synchronous>, transform_indices = @transform_3, window_bounds = array<i64: 16, 128>}, {transform_indices = @transform_4, window_bounds = array<i64: 16, 128>}]} {
    %c0_i32 = arith.constant 0 : i32
    %0 = arith.cmpi eq, %arg1, %c0_i32 : i32
    %1 = arith.extui %0 : i1 to i32
    %c0_i32_0 = arith.constant 0 : i32
    %2 = arith.cmpi ne, %1, %c0_i32_0 : i32
    scf.if %2 {
      %cst_16 = arith.constant 0.000000e+00 : f32
      %27 = vector.broadcast %cst_16 : f32 to vector<16x128xf32>
      %c0_17 = arith.constant 0 : index
      %c0_18 = arith.constant 0 : index
      %28 = vector.load %arg6[%c0_17, %c0_18] : memref<16x128xf32, #tpu.memory_space<vmem>>, vector<16x128xf32>
      tpu.vector_store %arg6[%c0_17, %c0_18], %27 {strides = array<i32>} : memref<16x128xf32, #tpu.memory_space<vmem>>, vector<16x128xf32>,
    } else {
    }
    %c0 = arith.constant 0 : index
    %c0_1 = arith.constant 0 : index
    %3 = vector.load %arg2[%c0, %c0_1] : memref<16x1xi32, #tpu.memory_space<vmem>>, vector<16x1xi32>
    %4 = tpu.iota {dimensions = array<i32: 1>} : vector<16x16xi32>
    %c16_i32 = arith.constant 16 : i32
    %5 = arith.muli %arg1, %c16_i32 : i32
    %6 = vector.broadcast %5 : i32 to vector<16x16xi32>
    %7 = arith.addi %4, %6 : vector<16x16xi32>
    %8 = vector.broadcast %3 : vector<16x1xi32> to vector<16x16xi32>
    %9 = arith.cmpi eq, %8, %7 : vector<16x16xi32>
    %10 = arith.extui %9 : vector<16x16xi1> to vector<16x16xi32>
    %11 = arith.sitofp %10 : vector<16x16xi32> to vector<16x16xf32>
    %12 = arith.truncf %11 : vector<16x16xf32> to vector<16x16xbf16>
    %c0_2 = arith.constant 0 : index
    %c0_3 = arith.constant 0 : index
    %13 = vector.load %arg3[%c0_2, %c0_3] : memref<16x128xbf16, #tpu.memory_space<vmem>>, vector<16x128xbf16>
    %cst = arith.constant dense<0.000000e+00> : vector<16x128xf32>
    %14 = tpu.matmul %12, %13, %cst {dimension_numbers = #tpu.dot_dimension_numbers<[1], [0], [0], [1], [0, 0, 1, 1], [], []>} : vector<16x16xbf16>, vector<16x128xbf16>, vector<16x128xf32> -> vector<16x128xf32>
    %c0_4 = arith.constant 0 : index
    %c0_5 = arith.constant 0 : index
    %15 = vector.load %arg4[%c0_4, %c0_5] : memref<16x128xbf16, #tpu.memory_space<vmem>>, vector<16x128xbf16>
    %cst_6 = arith.constant dense<0.000000e+00> : vector<16x128xf32>
    %16 = tpu.matmul %12, %15, %cst_6 {dimension_numbers = #tpu.dot_dimension_numbers<[1], [0], [0], [1], [0, 0, 1, 1], [], []>} : vector<16x16xbf16>, vector<16x128xbf16>, vector<16x128xf32> -> vector<16x128xf32>
    %17 = arith.addf %14, %16 : vector<16x128xf32>
    %c0_7 = arith.constant 0 : index
    %c0_8 = arith.constant 0 : index
    %18 = vector.load %arg5[%c0_7, %c0_8] : memref<16x128xbf16, #tpu.memory_space<vmem>>, vector<16x128xbf16>
    %cst_9 = arith.constant dense<0.000000e+00> : vector<16x128xf32>
    %19 = tpu.matmul %12, %18, %cst_9 {dimension_numbers = #tpu.dot_dimension_numbers<[1], [0], [0], [1], [0, 0, 1, 1], [], []>} : vector<16x16xbf16>, vector<16x128xbf16>, vector<16x128xf32> -> vector<16x128xf32>
    %20 = arith.addf %17, %19 : vector<16x128xf32>
    %c0_10 = arith.constant 0 : index
    %c0_11 = arith.constant 0 : index
    %21 = vector.load %arg6[%c0_10, %c0_11] : memref<16x128xf32, #tpu.memory_space<vmem>>, vector<16x128xf32>
    %22 = arith.addf %21, %20 : vector<16x128xf32>
    %c0_12 = arith.constant 0 : index
    %c0_13 = arith.constant 0 : index
    %23 = vector.load %arg6[%c0_12, %c0_13] : memref<16x128xf32, #tpu.memory_space<vmem>>, vector<16x128xf32>
    tpu.vector_store %arg6[%c0_12, %c0_13], %22 {strides = array<i32>} : memref<16x128xf32, #tpu.memory_space<vmem>>, vector<16x128xf32>,
    %c0_i32_14 = arith.constant 0 : i32
    %24 = arith.cmpi eq, %arg1, %c0_i32_14 : i32
    %25 = arith.extui %24 : i1 to i32
    %c0_i32_15 = arith.constant 0 : i32
    %26 = arith.cmpi ne, %25, %c0_i32_15 : i32
    scf.if %26 {
      %c0_16 = arith.constant 0 : index
      %c0_17 = arith.constant 0 : index
      %27 = vector.load %arg6[%c0_16, %c0_17] : memref<16x128xf32, #tpu.memory_space<vmem>>, vector<16x128xf32>
      %cst_18 = arith.constant dense<0.000000e+00> : vector<16xf32>
      %28 = vector.multi_reduction <add>, %27, %cst_18 [1] : vector<16x128xf32> to vector<16xf32>
      %29 = vector.shape_cast %28 : vector<16xf32> to vector<16x1xf32>
      %cst_19 = arith.constant 0.000000e+00 : f32
      %30 = vector.broadcast %cst_19 : f32 to vector<16x1xf32>
      %31 = arith.cmpf ogt, %29, %30 : vector<16x1xf32>
      %cst_20 = arith.constant 1.000000e+00 : f32
      %32 = vector.broadcast %cst_20 : f32 to vector<16x1xf32>
      %33 = arith.select %31, %29, %32 : vector<16x1xi1>, vector<16x1xf32>
      %34 = vector.broadcast %33 : vector<16x1xf32> to vector<16x128xf32>
      %35 = arith.divf %27, %34 : vector<16x128xf32>
      %c0_21 = arith.constant 0 : index
      %c0_22 = arith.constant 0 : index
      %36 = vector.load %arg6[%c0_21, %c0_22] : memref<16x128xf32, #tpu.memory_space<vmem>>, vector<16x128xf32>
      tpu.vector_store %arg6[%c0_21, %c0_22], %35 {strides = array<i32>} : memref<16x128xf32, #tpu.memory_space<vmem>>, vector<16x128xf32>,
    } else {
    }
    return
  }
  func.func @transform_0(%arg0: i32, %arg1: i32) -> (i32, i32) {
    %c0_i32 = arith.constant 0 : i32
    %c0_i32_0 = arith.constant 0 : i32
    return %arg0, %c0_i32 : i32, i32
  }
  func.func @transform_1(%arg0: i32, %arg1: i32) -> (i32, i32) {
    %c0_i32 = arith.constant 0 : i32
    %c0_i32_0 = arith.constant 0 : i32
    return %arg1, %c0_i32 : i32, i32
  }
  func.func @transform_2(%arg0: i32, %arg1: i32) -> (i32, i32) {
    %c0_i32 = arith.constant 0 : i32
    %c0_i32_0 = arith.constant 0 : i32
    return %arg1, %c0_i32 : i32, i32
  }
  func.func @transform_3(%arg0: i32, %arg1: i32) -> (i32, i32) {
    %c0_i32 = arith.constant 0 : i32
    %c0_i32_0 = arith.constant 0 : i32
    return %arg1, %c0_i32 : i32, i32
  }
  func.func @transform_4(%arg0: i32, %arg1: i32) -> (i32, i32) {
    %c0_i32 = arith.constant 0 : i32
    %c0_i32_0 = arith.constant 0 : i32
    return %arg0, %c0_i32 : i32, i32
  }
}

</mosaic_0001>

<bundles_post_ra>
// kernel: tpu_custom_call.1
= control target key start
LH: loop header
LB: loop body
LE: loop exit
PB: predicated region body
PF: predicated region fallthrough
CT: control target
= control target key end

     0   :  { %9 = vsyncpa [#allocation3], 0  ;;  %s339_s0 = inlined_call_operand.vmem [shape: s32[16,1], index: 0, kind: input, shape index: {}]   ;;  %s340_s1 = inlined_call_operand.vmem [shape: bf16[16,128], index: 1, kind: input, shape index: {}]   ;;  %s341_s2 = inlined_call_operand.vmem [shape: bf16[16,128], index: 2, kind: input, shape index: {}]   ;;  %s342_s3 = inlined_call_operand.hbm [shape: bf16[16,128], index: 3, kind: input, shape index: {}]   ;;  %s343_s4 = inlined_call_operand.hbm [shape: f32[16,128], index: 4, kind: output, shape index: {}]  }
   0x1   :  { %10 = vsyncpa [#allocation4], 0  ;;  %s21_s17 = sshll.u32 %s342_s3, 4  ;;  %s288_s18 = smov [#allocation2]   ;;  %s22_s17 = int_to_ptr.hbm [resolvable:$true] %s21_s17 }
   0x2   :  { %s23_s19 = sshll.u32 %s288_s18, 4  ;;  %s289_s20 = smov 64   ;;  %s24_s19 = int_to_ptr.vmem [resolvable:$true] %s23_s19 }
   0x3   :  { %s290_s21 = smov 4  }
   0x4   :  { %29 = dma.hbm_to_vmem [thread:$0]  %s22_s17, 128, %s24_s19, [#allocation3], %s289_s20, %s289_s20, %s290_s21  }
   0x5   :  { %284 = dma.done.wait [#allocation3], 128  }
   0x6   :  { %285 = vsyncadd [#allocation3], 4294967168  ;;  %v291_v0 = vmov 0   ;;  %v41_v1 = vld [vmem:[%s339_s0] sm:$0xff]  ;;  %v42_v2 = vld [vmem:[%s339_s0 + $0x8] sm:$0xff]  ;;  %v43_v6 = vlaneseq  ;;  %v292_v10 = vmov 0.0  }
   0x7   :  { %231 = vset.pattern.permute.xlu0 %v291_v0  ;;  %v221_v3 = vld [vmem:[%s341_s2] sm:$0xff]  ;;  %vm71_vm2 = vcmask 130048   ;;  %s293_s0 = smov [#allocation5]   ;;  %s190_s30 = sshll.u32 %s343_s4, 4  ;;  %s191_s30 = int_to_ptr.hbm [resolvable:$true] %s190_s30 }
   0x8   :  { %49 = vperm.xlu0 %231, %v41_v1   ;;  %v220_v4 = vld [vmem:[%s340_s1] sm:$0xff]  ;;  %82 = vmatpush.bf16.msra.mxu0 %v221_v3  ;;  %v44_v8 = vand.u32 127, %v43_v6  ;;  %s188_s1 = sshll.u32 %s293_s0, 4  ;;  %s294_s5 = smov 128   ;;  %s189_s1 = int_to_ptr.vmem [resolvable:$true] %s188_s1 }
   0x9   :  { %v222_v5 = vld [vmem:[#allocation2] sm:$0xff]  ;;  %102 = vmatpush.bf16.msra.mxu1 %v220_v4  ;;  %s295_s6 = smov 8  }
   0xa   :  { %124 = vmatpush.bf16.msra.mxu2 %v222_v5 }
  0x10   :  { %52 = vperm.xlu0 %231, %v42_v2  }
  0x7a   :  { %v50_v7 = vpop.permute.xlu0 %49 }
  0x7b   :  { %vm54_vm0 = vcmp.eq.s32.totalorder %v50_v7, %v44_v8 }
  0x7c   :  { %v203_v11 = vsel %vm54_vm0, 1.0, %v292_v10 }
  0x82   :  { %v53_v9 = vpop.permute.xlu0 %52 }
  0x83   :  { %vm55_vm1 = vcmp.eq.s32.totalorder %v53_v9, %v44_v8 }
  0x84   :  { %v204_v12 = vsel %vm55_vm1, 1.0, %v292_v10 }
  0x85   :  { %v60_v13 = vpack.c.bf16 %v204_v12, %v203_v11 }
  0x87   :  { %209 = vmatmul.msk.bf16.vlgmr.msra.gmra.mxu0 %vm71_vm2, %v60_v13  ;;  %214 = vmatmul.msk.bf16.vlgmr.msra.gmra.mxu1 %vm71_vm2, %v60_v13 }
  0x88   :  { %219 = vmatmul.msk.bf16.vlgmr.msra.gmra.mxu2 %vm71_vm2, %v60_v13 }
 0x104   :  { %v84_v14 = vpop.f32.mrf.mxu0  ;;  %v104_v15 = vpop.f32.mrf.mxu1 }
 0x105   :  { %v105_v16 = vadd.f32 %v104_v15, %v84_v14 }
 0x10b   :  { %v126_v17 = vpop.f32.mrf.mxu2 }
 0x10c   :  { %v131_v18 = vadd.f32 %v126_v17, %v105_v16  ;;  %v86_v19 = vpop.f32.mrf.mxu0  ;;  %v106_v20 = vpop.f32.mrf.mxu1 }
 0x10d   :  { %v107_v21 = vadd.f32 %v106_v20, %v86_v19 }
 0x10e   :  { %144 = vadd.xlane.f32.xlu1 %v131_v18 }
 0x113   :  { %v128_v22 = vpop.f32.mrf.mxu2 }
 0x114   :  { %v132_v23 = vadd.f32 %v128_v22, %v107_v21 }
 0x116   :  { %146 = vadd.xlane.f32.xlu1 %v132_v23 }
 0x181   :  { %v145_v24 = vpop.xlane.xlu1 %144 }
 0x182   :  { %vm148_vm3 = vcmp.gt.f32.partialorder %v145_v24, 0.0 }
 0x183   :  { %v150_v25 = vsel %vm148_vm3, %v145_v24, 1.0 }
 0x184   :  { %232 = vrcp.f32 %v150_v25  ;;  %v163_v31 = vand.u32 2147483648, %v150_v25  ;;  %v161_v33 = vand.u32 2147483647, %v150_v25  ;;  %vm157_vm6 = vweird.f32 %v150_v25 }
 0x186   :  { %v164_v36 = vor.u32 1.1754944e-38, %v163_v31  ;;  %vm162_vm8 = vcmp.eq.f32.partialorder %v161_v33, 8.507059e+37 }
 0x189   :  { %v147_v26 = vpop.xlane.xlu1 %146 }
 0x18a   :  { %v233_v27 = vpop.eup %232  ;;  %vm149_vm4 = vcmp.gt.f32.partialorder %v147_v26, 0.0 }
 0x18b   :  { %v153_v28 = vmul.f32 %v233_v27, %v150_v25  ;;  %v151_v29 = vsel %vm149_vm4, %v147_v26, 1.0  ;;  %vm158_vm5 = vweird.f32 %v233_v27 }
 0x18c   :  { %234 = vrcp.f32 %v151_v29  ;;  %vm159_vm7 = vmor %vm157_vm6, %vm158_vm5  ;;  %v178_v42 = vand.u32 2147483648, %v151_v29  ;;  %v176_v44 = vand.u32 2147483647, %v151_v29  ;;  %vm172_vm10 = vweird.f32 %v151_v29 }
 0x18d   :  { %v154_v30 = vsub.f32 1.0, %v153_v28 }
 0x18e   :  { %v179_v46 = vor.u32 1.1754944e-38, %v178_v42  ;;  %vm177_vm12 = vcmp.eq.f32.partialorder %v176_v44, 8.507059e+37 }
 0x18f   :  { %v155_v32 = vmul.f32 %v233_v27, %v154_v30 }
 0x191   :  { %v156_v34 = vadd.f32 %v233_v27, %v155_v32 }
 0x192   :  { %v235_v35 = vpop.eup %234 }
 0x193   :  { %v160_v37 = vsel %vm159_vm7, %v233_v27, %v156_v34  ;;  %v168_v38 = vmul.f32 %v235_v35, %v151_v29  ;;  %vm173_vm9 = vweird.f32 %v235_v35 }
 0x194   :  { %v165_v39 = vsel %vm162_vm8, %v164_v36, %v160_v37  ;;  %vm174_vm11 = vmor %vm172_vm10, %vm173_vm9 }
 0x195   :  { %v166_v40 = vmul.f32 %v165_v39, %v131_v18  ;;  %v169_v41 = vsub.f32 1.0, %v168_v38 }
 0x197   :  { %182 = vst [vmem:[#allocation5] sm:$0xff] %v166_v40  ;;  %v170_v43 = vmul.f32 %v235_v35, %v169_v41 }
 0x199   :  { %v171_v45 = vadd.f32 %v235_v35, %v170_v43 }
 0x19b   :  { %v175_v47 = vsel %vm174_vm11, %v235_v35, %v171_v45 }
 0x19c   :  { %v180_v48 = vsel %vm177_vm12, %v179_v46, %v175_v47 }
 0x19d   :  { %v181_v49 = vmul.f32 %v180_v48, %v132_v23 }
 0x19f   :  { %183 = vst [vmem:[#allocation5 + $0x8] sm:$0xff] %v181_v49 }
 0x1a0   :  { %196 = dma.vmem_to_hbm [thread:$0]  %s189_s1, 256, %s191_s30, [#allocation4], %s294_s5, %s294_s5, %s295_s6  }
 0x1a1   :  { %286 = dma.done.wait [#allocation4], 256  }
 0x1a2   :  { %287 = vsyncadd [#allocation4], 4294967040 }
 0x1a3   :  { %201 = vsyncpa [#allocation3], 1 }
 0x1a4   :  { %202 = vsyncpa [#allocation4], 1 }

</bundles_post_ra>
